<compile_context>
chip_gen: v5e
topology: v5e:2x2
jax: 0.10.0
libtpu: 0.0.40
codegen_flags: <defaults>
</compile_context>

<pallas_src>
import jax
import jax.numpy as jnp
import numpy as np
from jax import lax
from jax.experimental import pallas as pl
from jax.experimental.pallas import tpu as pltpu

KH = KW = 3
PAD = 1

# f32 for the verified run; jnp.bfloat16 halves streamed HBM bytes at scale
# (accumulation stays f32) at the cost of ReLU-gate perturbations near zero.
STREAM_DTYPE = jnp.float32


# ----------------------------- Pallas kernel -------------------------------

def _fused_grad_kernel(cols_ref, w1m_ref, wsum_ref, mt_ref, dw1_ref, dw2_ref):
    """One grid step = one image tile (lane-dense positions).

    Shapes (C1 = conv1 out ch, K1 = Cin*9, T = tile of N*H*W positions):
      cols_ref : (K1, T)  im2col(x) slab for this tile (streamed)
      w1m_ref  : (C1, K1) conv1 weight, PyTorch reshape order (resident)
      wsum_ref : (C1, 9)  sum over conv2 output channels of W2 (resident)
      mt_ref   : (9, T)   g2-scaled tap-validity mask (resident, N-invariant)
      dw1_ref  : (C1, K1) dL/dW1 accumulator (VMEM-resident across the grid)
      dw2_ref  : (C1, 9)  per-(ci,kh,kw) dL/dW2 row (same for every out ch)
    """
    @pl.when(pl.program_id(0) == 0)
    def _init():
        dw1_ref[...] = jnp.zeros_like(dw1_ref)
        dw2_ref[...] = jnp.zeros_like(dw2_ref)

    cols = cols_ref[...]                                        # (K1, T)

    # conv1 forward: channels on sublanes, positions lane-dense.
    z1t = jnp.dot(w1m_ref[...], cols,
                  preferred_element_type=jnp.float32)           # (C1, T)
    a1t = jnp.maximum(z1t, 0.0)                                 # ReLU

    mt = mt_ref[...]                                            # (9, T)

    # conv2 weight grad: upstream grad is the constant g2 (folded into mt), so
    # dW2[co, ci, kh, kw] = g2 * sum_r im2col(a1)[r, (ci,kh,kw)] for every co.
    # Contract over the lane (position) axis -> no transposed mask needed.
    dw2_ref[...] += lax.dot_general(
        a1t, mt, (((1,), (1,)), ((), ())),
        preferred_element_type=jnp.float32)                     # (C1, 9)

    # grad into conv2's input (col2im of constant rows), then ReLU backward
    # (gate on a1t > 0 == z1t > 0; ends z1t's live range at the ReLU).
    da1t = jnp.dot(wsum_ref[...], mt,
                   preferred_element_type=jnp.float32)          # (C1, T)
    dz1t = jnp.where(a1t > 0.0, da1t, 0.0).astype(cols.dtype)

    # conv1 weight grad: contract over lanes against the SAME im2col slab —
    # the second (NHW, K1) orientation is never built or streamed.
    dw1_ref[...] += lax.dot_general(
        dz1t, cols, (((1,), (1,)), ((), ())),
        preferred_element_type=jnp.float32)                     # (C1, K1)


# ------------------------------ JAX glue ------------------------------------

def _im2col_t_nchw(x):
    """[N, C, H, W] -> [C*KH*KW, N*H*W] (lane-dense positions).

    Row order (C, KH, KW) matches W1.reshape(C1, C*KH*KW); fused by XLA under
    jit — only this single orientation is ever materialized.
    """
    N, C, H, W = x.shape
    xp = jnp.pad(x, ((0, 0), (0, 0), (PAD, PAD), (PAD, PAD)))
    patches = [xp[:, :, i:i + H, j:j + W] for i in range(KH) for j in range(KW)]
    cols = jnp.stack(patches, axis=0)                 # (9, N, C, H, W)
    return cols.transpose(2, 0, 1, 3, 4).reshape(C * KH * KW, N * H * W)


def _tap_mask_t(H, W):
    """(KH*KW, H*W) 0/1 matrix: entry [(kh,kw), (h,w)] is 1 iff the activation
    at (h,w) contributes at tap (kh,kw) of a 3x3 / pad-1 conv (col2im validity).
    Image-index invariant, so one copy serves every grid step."""
    hw = np.arange(H * W)
    h = hw // W
    w = hw % W
    m = np.zeros((KH * KW, H * W), np.float32)
    for i in range(KH):
        for j in range(KW):
            h_ok = (h >= max(i - 1, 0)) & (h < min(i - 1 + H, H))
            w_ok = (w >= max(j - 1, 0)) & (w < min(j - 1 + W, W))
            m[i * KW + j] = (h_ok & w_ok).astype(np.float32)
    return m


@jax.jit
def _extract_gradients(x, W1, W2):
    N, Cin, H, W = x.shape
    C1, C2 = W1.shape[0], W2.shape[0]
    NHW = N * H * W
    K1 = Cin * KH * KW

    cols1t = _im2col_t_nchw(x).astype(STREAM_DTYPE)   # (K1, NHW) — single copy
    w1m = W1.reshape(C1, K1).astype(STREAM_DTYPE)     # PyTorch weight order
    wsum = jnp.sum(W2, axis=0).reshape(C1, KH * KW)   # (C1, 9), f32

    g2 = np.float32(1.0 / (NHW * C2))                 # d(mean)/d(out) element
    m_img = _tap_mask_t(H, W)                         # (9, H*W) constant

    if (H * W) % 128 == 0:
        # One image per grid step: lane-dense 128-multiple tiles, the small
        # mask is shared (block index constant) across all steps.
        tile, steps, m_np = H * W, N, m_img
    else:
        # Fallback: single step over the full (lane-dense) NHW axis.
        tile, steps, m_np = NHW, 1, np.tile(m_img, (1, N))
    mt = jnp.asarray(g2 * m_np, jnp.float32)          # folded at compile time

    dw1m, dw2s = pl.pallas_call(
        _fused_grad_kernel,
        grid=(steps,),
        out_shape=(jax.ShapeDtypeStruct((C1, K1), jnp.float32),
                   jax.ShapeDtypeStruct((C1, KH * KW), jnp.float32)),
        in_specs=[
            pl.BlockSpec((K1, tile), lambda n: (0, n)),        # streamed slab
            pl.BlockSpec((C1, K1), lambda n: (0, 0)),          # resident
            pl.BlockSpec((C1, KH * KW), lambda n: (0, 0)),     # resident
            pl.BlockSpec((KH * KW, tile), lambda n: (0, 0)),   # resident mask
        ],
        out_specs=(pl.BlockSpec((C1, K1), lambda n: (0, 0)),   # accumulators
                   pl.BlockSpec((C1, KH * KW), lambda n: (0, 0))),
        compiler_params=pltpu.CompilerParams(
            dimension_semantics=("arbitrary",),
            vmem_limit_bytes=32 * 1024 * 1024),
    )(cols1t, w1m, wsum, mt)

    dW1 = dw1m.reshape(C1, Cin, KH, KW)
    # Every conv2 output channel sees the same constant upstream grad g2, so
    # its weight-grad rows are identical -> broadcast the per-(ci,kh,kw) row.
    dW2 = jnp.broadcast_to(dw2s.reshape(1, C1, KH, KW), (C2, C1, KH, KW))
    return {"conv1": dW1, "conv2": dW2}


# --------------------------- GradientExtractor ------------------------------

class GradientExtractor:
    """JAX/Pallas analogue of the PyTorch GradientExtractor for the fixed
    synthetic model conv1 -> ReLU -> conv2 with loss(out) = out.mean().

    __call__(x) backpropagates the mean loss and returns {layer_id: dL/dW}.
    """

    def __init__(self, params, layers=("conv1", "conv2")):
        # params: dict layer_id -> conv weight [Cout, Cin, KH, KW]
        self.params = params
        self.layers = tuple(layers)
        self._gradients = {}
        # TODO(synk): generic register_backward_hook on an arbitrary wrapped
        # nn.Module / arbitrary loss has no Pallas equivalent; this fixed graph
        # is backpropagated explicitly inside one fused kernel instead.

    def __call__(self, x):
        grads = _extract_gradients(x, self.params["conv1"], self.params["conv2"])
        self._gradients = {k: grads[k] for k in self.layers}
        return self._gradients


# ---------------------------------- main ------------------------------------

if __name__ == "__main__":
    key = jax.random.PRNGKey(0)
    kx, k1, k2 = jax.random.split(key, 3)

    N, Cin, H, W = 2, 4, 16, 16
    C1, C2 = 8, 8

    x = jax.random.normal(kx, (N, Cin, H, W), jnp.float32)
    W1 = 0.1 * jax.random.normal(k1, (C1, Cin, KH, KW), jnp.float32)
    W2 = 0.1 * jax.random.normal(k2, (C2, C1, KH, KW), jnp.float32)

    extractor = GradientExtractor({"conv1": W1, "conv2": W2},
                                  layers=("conv1", "conv2"))
    grads = extractor(x)
    grads = jax.block_until_ready(grads)

    # Pure-JAX reference (autodiff through NCHW convs) for a sanity check.
    def ref_loss(ws):
        w1, w2 = ws
        z1 = lax.conv_general_dilated(
            x, w1, (1, 1), "SAME",
            dimension_numbers=("NCHW", "OIHW", "NCHW"),
            precision=lax.Precision.HIGHEST)
        a1 = jnp.maximum(z1, 0.0)
        z2 = lax.conv_general_dilated(
            a1, w2, (1, 1), "SAME",
            dimension_numbers=("NCHW", "OIHW", "NCHW"),
            precision=lax.Precision.HIGHEST)
        return jnp.mean(z2)

    gref1, gref2 = jax.grad(ref_loss)((W1, W2))

    assert grads["conv1"].shape == (C1, Cin, KH, KW)
    assert grads["conv2"].shape == (C2, C1, KH, KW)
    assert np.allclose(np.asarray(grads["conv1"]), np.asarray(gref1),
                       rtol=2e-2, atol=1e-5)
    assert np.allclose(np.asarray(grads["conv2"]), np.asarray(gref2),
                       rtol=2e-2, atol=1e-5)
    print("KERNEL_OK")
</pallas_src>

<mosaic_0001>
module attributes {stable_mosaic.version = 11 : i64} {
  func.func @_fused_grad_kernel(%arg0: i32, %arg1: memref<36x256xf32, #tpu.memory_space<vmem>>, %arg2: memref<8x36xf32, #tpu.memory_space<vmem>>, %arg3: memref<8x9xf32, #tpu.memory_space<vmem>>, %arg4: memref<9x256xf32, #tpu.memory_space<vmem>>, %arg5: memref<8x36xf32, #tpu.memory_space<vmem>>, %arg6: memref<8x9xf32, #tpu.memory_space<vmem>>) attributes {dimension_semantics = [#tpu.dimension_semantics<arbitrary>], iteration_bounds = array<i64: 2>, scalar_prefetch = 0 : i64, scratch_operands = 0 : i64, tpu.core_type = #tpu.core_type<tc>, window_params = [{transform_indices = @transform_0, window_bounds = array<i64: 36, 256>}, {pipeline_mode = #tpu.pipeline_mode<synchronous>, transform_indices = @transform_1, window_bounds = array<i64: 8, 36>}, {pipeline_mode = #tpu.pipeline_mode<synchronous>, transform_indices = @transform_2, window_bounds = array<i64: 8, 9>}, {pipeline_mode = #tpu.pipeline_mode<synchronous>, transform_indices = @transform_3, window_bounds = array<i64: 9, 256>}, {pipeline_mode = #tpu.pipeline_mode<synchronous>, transform_indices = @transform_4, window_bounds = array<i64: 8, 36>}, {pipeline_mode = #tpu.pipeline_mode<synchronous>, transform_indices = @transform_5, window_bounds = array<i64: 8, 9>}]} {
    %c0_i32 = arith.constant 0 : i32
    %0 = arith.cmpi eq, %arg0, %c0_i32 : i32
    %1 = arith.extui %0 : i1 to i32
    %c0_i32_0 = arith.constant 0 : i32
    %2 = arith.cmpi ne, %1, %c0_i32_0 : i32
    scf.if %2 {
      %cst_22 = arith.constant 0.000000e+00 : f32
      %23 = vector.broadcast %cst_22 : f32 to vector<8x36xf32>
      %c0_23 = arith.constant 0 : index
      %c0_24 = arith.constant 0 : index
      %24 = vector.load %arg5[%c0_23, %c0_24] : memref<8x36xf32, #tpu.memory_space<vmem>>, vector<8x36xf32>
      tpu.vector_store %arg5[%c0_23, %c0_24], %23 {strides = array<i32>} : memref<8x36xf32, #tpu.memory_space<vmem>>, vector<8x36xf32>,
      %cst_25 = arith.constant 0.000000e+00 : f32
      %25 = vector.broadcast %cst_25 : f32 to vector<8x9xf32>
      %c0_26 = arith.constant 0 : index
      %c0_27 = arith.constant 0 : index
      %26 = vector.load %arg6[%c0_26, %c0_27] : memref<8x9xf32, #tpu.memory_space<vmem>>, vector<8x9xf32>
      tpu.vector_store %arg6[%c0_26, %c0_27], %25 {strides = array<i32>} : memref<8x9xf32, #tpu.memory_space<vmem>>, vector<8x9xf32>,
    } else {
    }
    %c0 = arith.constant 0 : index
    %c0_1 = arith.constant 0 : index
    %3 = vector.load %arg1[%c0, %c0_1] : memref<36x256xf32, #tpu.memory_space<vmem>>, vector<36x256xf32>
    %c0_2 = arith.constant 0 : index
    %c0_3 = arith.constant 0 : index
    %4 = vector.load %arg2[%c0_2, %c0_3] : memref<8x36xf32, #tpu.memory_space<vmem>>, vector<8x36xf32>
    %cst = arith.constant dense<0.000000e+00> : vector<8x256xf32>
    %5 = tpu.matmul %4, %3, %cst {dimension_numbers = #tpu.dot_dimension_numbers<[1], [0], [0], [1], [0, 0, 1, 1], [], []>} : vector<8x36xf32>, vector<36x256xf32>, vector<8x256xf32> -> vector<8x256xf32>
    %cst_4 = arith.constant 0.000000e+00 : f32
    %6 = vector.broadcast %cst_4 : f32 to vector<8x256xf32>
    %7 = arith.maximumf %5, %6 : vector<8x256xf32>
    %c0_5 = arith.constant 0 : index
    %c0_6 = arith.constant 0 : index
    %8 = vector.load %arg4[%c0_5, %c0_6] : memref<9x256xf32, #tpu.memory_space<vmem>>, vector<9x256xf32>
    %c0_7 = arith.constant 0 : index
    %c0_8 = arith.constant 0 : index
    %9 = vector.load %arg6[%c0_7, %c0_8] : memref<8x9xf32, #tpu.memory_space<vmem>>, vector<8x9xf32>
    %cst_9 = arith.constant dense<0.000000e+00> : vector<8x9xf32>
    %10 = tpu.matmul %7, %8, %cst_9 {dimension_numbers = #tpu.dot_dimension_numbers<[1], [1], [0], [0], [0, 0, 1, 0], [], []>} : vector<8x256xf32>, vector<9x256xf32>, vector<8x9xf32> -> vector<8x9xf32>
    %11 = arith.addf %9, %10 : vector<8x9xf32>
    %c0_10 = arith.constant 0 : index
    %c0_11 = arith.constant 0 : index
    %12 = vector.load %arg6[%c0_10, %c0_11] : memref<8x9xf32, #tpu.memory_space<vmem>>, vector<8x9xf32>
    tpu.vector_store %arg6[%c0_10, %c0_11], %11 {strides = array<i32>} : memref<8x9xf32, #tpu.memory_space<vmem>>, vector<8x9xf32>,
    %c0_12 = arith.constant 0 : index
    %c0_13 = arith.constant 0 : index
    %13 = vector.load %arg3[%c0_12, %c0_13] : memref<8x9xf32, #tpu.memory_space<vmem>>, vector<8x9xf32>
    %cst_14 = arith.constant dense<0.000000e+00> : vector<8x256xf32>
    %14 = tpu.matmul %13, %8, %cst_14 {dimension_numbers = #tpu.dot_dimension_numbers<[1], [0], [0], [1], [0, 0, 1, 1], [], []>} : vector<8x9xf32>, vector<9x256xf32>, vector<8x256xf32> -> vector<8x256xf32>
    %cst_15 = arith.constant 0.000000e+00 : f32
    %15 = vector.broadcast %cst_15 : f32 to vector<8x256xf32>
    %16 = arith.cmpf ogt, %7, %15 : vector<8x256xf32>
    %cst_16 = arith.constant 0.000000e+00 : f32
    %17 = vector.broadcast %cst_16 : f32 to vector<8x256xf32>
    %18 = arith.select %16, %14, %17 : vector<8x256xi1>, vector<8x256xf32>
    %c0_17 = arith.constant 0 : index
    %c0_18 = arith.constant 0 : index
    %19 = vector.load %arg5[%c0_17, %c0_18] : memref<8x36xf32, #tpu.memory_space<vmem>>, vector<8x36xf32>
    %cst_19 = arith.constant dense<0.000000e+00> : vector<8x36xf32>
    %20 = tpu.matmul %18, %3, %cst_19 {dimension_numbers = #tpu.dot_dimension_numbers<[1], [1], [0], [0], [0, 0, 1, 0], [], []>} : vector<8x256xf32>, vector<36x256xf32>, vector<8x36xf32> -> vector<8x36xf32>
    %21 = arith.addf %19, %20 : vector<8x36xf32>
    %c0_20 = arith.constant 0 : index
    %c0_21 = arith.constant 0 : index
    %22 = vector.load %arg5[%c0_20, %c0_21] : memref<8x36xf32, #tpu.memory_space<vmem>>, vector<8x36xf32>
    tpu.vector_store %arg5[%c0_20, %c0_21], %21 {strides = array<i32>} : memref<8x36xf32, #tpu.memory_space<vmem>>, vector<8x36xf32>,
    return
  }
  func.func @transform_0(%arg0: i32) -> (i32, i32) {
    %c0_i32 = arith.constant 0 : i32
    %c0_i32_0 = arith.constant 0 : i32
    return %c0_i32, %arg0 : i32, i32
  }
  func.func @transform_1(%arg0: i32) -> (i32, i32) {
    %c0_i32 = arith.constant 0 : i32
    %c0_i32_0 = arith.constant 0 : i32
    %c0_i32_1 = arith.constant 0 : i32
    return %c0_i32, %c0_i32_0 : i32, i32
  }
  func.func @transform_2(%arg0: i32) -> (i32, i32) {
    %c0_i32 = arith.constant 0 : i32
    %c0_i32_0 = arith.constant 0 : i32
    %c0_i32_1 = arith.constant 0 : i32
    return %c0_i32, %c0_i32_0 : i32, i32
  }
  func.func @transform_3(%arg0: i32) -> (i32, i32) {
    %c0_i32 = arith.constant 0 : i32
    %c0_i32_0 = arith.constant 0 : i32
    %c0_i32_1 = arith.constant 0 : i32
    return %c0_i32, %c0_i32_0 : i32, i32
  }
  func.func @transform_4(%arg0: i32) -> (i32, i32) {
    %c0_i32 = arith.constant 0 : i32
    %c0_i32_0 = arith.constant 0 : i32
    %c0_i32_1 = arith.constant 0 : i32
    return %c0_i32, %c0_i32_0 : i32, i32
  }
  func.func @transform_5(%arg0: i32) -> (i32, i32) {
    %c0_i32 = arith.constant 0 : i32
    %c0_i32_0 = arith.constant 0 : i32
    %c0_i32_1 = arith.constant 0 : i32
    return %c0_i32, %c0_i32_0 : i32, i32
  }
}

</mosaic_0001>

<bundles_post_ra>
// kernel: _extract_gradients.1
= control target key start
LH: loop header
LB: loop body
LE: loop exit
PB: predicated region body
PF: predicated region fallthrough
CT: control target
= control target key end

     0   :  { %s607_s18 = smov 0   ;;  %s609_s19 = smov 0   ;;  %s698_s0 = inlined_call_operand.vmem [shape: f32[36,512], index: 0, kind: input, shape index: {}]   ;;  %s699_s1 = inlined_call_operand.vmem [shape: f32[8,36], index: 1, kind: input, shape index: {}]   ;;  %s700_s2 = inlined_call_operand.vmem [shape: f32[8,9], index: 2, kind: input, shape index: {}]   ;;  %s701_s3 = inlined_call_operand.vmem [shape: f32[9,256], index: 3, kind: input, shape index: {}]   ;;  %s702_s4 = inlined_call_operand.vmem [shape: f32[8,36], index: 4, kind: output, shape index: {0}]   ;;  %s703_s5 = inlined_call_operand.vmem [shape: f32[8,9], index: 5, kind: output, shape index: {1}]  }
   0x1   :  { %s611_s20 = smov 0  }
   0x2 LB: > { %s505_s21 = sadd.s32 4294967295, %s574_s20   ;;  %s624_s22 = sadd.s32 1, %s574_s20   ;;  %s574_s20 = sphi %s611_s20, %s706_s20   ;;  %s570_s19 = sphi %s609_s19, %s705_s19   ;;  %s566_s18 = sphi %s607_s18, %s704_s18  }
   0x3   : > { %s20_s23 = ssub.s32 %s574_s20, %s624_s22  ;;  %s23_s24 = sadd.s32 1, %s570_s19 }
   0x4   : > { %p21_p0 = scmp.eq.s32.totalorder %s20_s23, 0  ;;  %p30_p1 = scmp.ne.s32.totalorder %s570_s19, %s566_s18 }
   0x5   : > { %p31_p2 = scmp.eq.s32.totalorder %s574_s20, 0  ;;  %p507_p4 = scmp.ge.s32.totalorder %s574_s20, 2 }
   0x6   : > { %s633_s25 = scalar_select %p21_p0, %s570_s19, %s23_s24  }
   0x7   : > { %p32_p3 = por %p31_p2, %p30_p1  ;;  %170 = sbr.rel (%p507_p4) target bundleno = 26 (0x1a), region = 28 }
   0xc   : > { %173 = sbr.rel (!%p32_p3) target bundleno = 26 (0x1a), region = 32  ;;  %s175_s26 = sand.u32 (%p32_p3), 1, %s570_s19  }
   0xd   : > { %s524_s27 = sshll.u32 (%p32_p3), %s574_s20, 4  ;;  %s525_s28 = smul.u32 (%p32_p3), 80, %s175_s26 }
   0xe   : > { %s180_s6 = scalar_lea.vmem (%p32_p3), %s698_s0, %s524_s27 }
   0xf   : > { %v193_v0 = vld [vmem:[%s180_s6] sm:$0xff] (%p32_p3)  ;;  %v195_v1 = vld [vmem:[%s180_s6 + $0x8] sm:$0xff] (%p32_p3)  ;;  %s177_s7 = scalar_lea.vmem (%p32_p3), [#allocation2], %s525_s28 }
  0x10   : > { %v197_v2 = vld [vmem:[%s180_s6 + $0x20] sm:$0xff] (%p32_p3)  ;;  %194 = vst [vmem:[%s177_s7] sm:$0xff] (%p32_p3), %v193_v0  ;;  %v199_v3 = vld [vmem:[%s180_s6 + $0x28] sm:$0xff] (%p32_p3) }
  0x11   : > { %196 = vst [vmem:[%s177_s7 + $0x8] sm:$0xff] %v195_v1  ;;  %v201_v4 = vld [vmem:[%s180_s6 + $0x40] sm:$0xff]  ;;  %v203_v5 = vld [vmem:[%s180_s6 + $0x48] sm:$0xff] }
  0x12   : > { %198 = vst [vmem:[%s177_s7 + $0x10] sm:$0xff] %v197_v2  ;;  %v205_v6 = vld [vmem:[%s180_s6 + $0x60] sm:$0xff]  ;;  %v207_v7 = vld [vmem:[%s180_s6 + $0x68] sm:$0xff] }
  0x13   : > { %200 = vst [vmem:[%s177_s7 + $0x18] sm:$0xff] %v199_v3  ;;  %v209_v8 = vld [vmem:[%s180_s6 + $0x80] sm:$0xff]  ;;  %v211_v9 = vld [vmem:[%s180_s6 + $0x88] sm:$0xff] }
  0x14   : > { %202 = vst [vmem:[%s177_s7 + $0x20] sm:$0xff] %v201_v4 }
  0x15   : > { %204 = vst [vmem:[%s177_s7 + $0x28] sm:$0xff] %v203_v5 }
  0x16   : > { %206 = vst [vmem:[%s177_s7 + $0x30] sm:$0xff] %v205_v6 }
  0x17   : > { %208 = vst [vmem:[%s177_s7 + $0x38] sm:$0xff] %v207_v7 }
  0x18   : > { %210 = vst [vmem:[%s177_s7 + $0x40] sm:$0xff] %v209_v8 }
  0x19   : > { %212 = vst [vmem:[%s177_s7 + $0x48] sm:$0xff] %v211_v9 }
  0x1a PF: > { %p510_p5 = scmp.ge.s32.totalorder %s574_s20, 1  ;;  %p217_p6 = scmp.lt.s32.totalorder %s574_s20, 3 }
  0x1c   : > { %p218_p7 = pnand %p510_p5, %p217_p6 }
  0x1d   : > { %s224_s8 = sand.u32 (!%p218_p7), 1, %s566_s18   ;;  %p511_p8 = scmp.ne.s32.totalorder (!%p218_p7), %s505_s21, 0 }
  0x1e   : > { %221 = sbr.rel (%p218_p7) target bundleno = 458 (0x1ca), region = 55 }
  0x1f   : > { %s526_s9 = smul.u32 (!%p218_p7), 80, %s224_s8 }
  0x21   : > { %s226_s10 = scalar_lea.vmem (!%p218_p7), [#allocation2], %s526_s9 }
  0x23   : > { %250 = sbr.rel (%p511_p8) target bundleno = 43 (0x2b), region = 63 }
  0x28   : > { %vm251_vm0 = vcmask 293888   ;;  %vm253_vm1 = vcmask 72704   ;;  %v576_v10 = vmov 0.0  }
  0x29   : > { %252 = vst.msk [vmem:[%s702_s4] sm:$0xff] %vm251_vm0, %v576_v10 }
  0x2a   : > { %254 = vst.msk [vmem:[%s703_s5] sm:$0xff] %vm253_vm1, %v576_v10 }
  0x2b PF: > { %v263_v11 = vld [vmem:[%s226_s10 + $0x40] sm:$0xf]  ;;  %vm270_vm2 = vcmask 1043456   ;;  %v264_v12 = vld [vmem:[%s226_s10 + $0x48] sm:$0xf]  ;;  %v261_v13 = vld [vmem:[%s226_s10 + $0x30] sm:$0xff] }
  0x2c   : > { %512 = vmatpush.msk.msra.mxu2 %vm270_vm2, %v263_v11  ;;  %514 = vmatpush.msk.msra.mxu3 %vm270_vm2, %v264_v12  ;;  %v262_v14 = vld [vmem:[%s226_s10 + $0x38] sm:$0xff]  ;;  %v259_v15 = vld [vmem:[%s226_s10 + $0x20] sm:$0xff]  ;;  %v260_v16 = vld [vmem:[%s226_s10 + $0x28] sm:$0xff]  ;;  %vm266_vm3 = vcmask 293888   ;;  %vm371_vm4 = vcmask 1040384   ;;  %vm365_vm5 = vcmask 72704  }
  0x2d   : > { %454 = vmatpush.xpose.msra.mxu1 %v264_v12  ;;  %v257_v17 = vld [vmem:[%s226_s10 + $0x10] sm:$0xff]  ;;  %v258_v18 = vld [vmem:[%s226_s10 + $0x18] sm:$0xff]  ;;  %v255_v19 = vld [vmem:[%s226_s10] sm:$0xff] }
  0x2e   : > { %289 = vmatpush.msra.mxu2 %v261_v13  ;;  %309 = vmatpush.msra.mxu3 %v262_v14  ;;  %v256_v20 = vld [vmem:[%s226_s10 + $0x8] sm:$0xff]  ;;  %v265_v21 = vld [vmem:[%s699_s1] sm:$0xff]  ;;  %v321_v23 = vld [vmem:[%s701_s3 + $0x10] sm:$0x1] }
  0x2f   : > { %v322_v22 = vld [vmem:[%s701_s3 + $0x18] sm:$0x1]  ;;  %v320_v24 = vld [vmem:[%s701_s3 + $0x8] sm:$0xff]  ;;  %v319_v25 = vld [vmem:[%s701_s3] sm:$0xff]  ;;  %516 = vmatpush.msk.msra.mxu0 %vm371_vm4, %v321_v23 }
  0x30   : > { %290 = vmatpush.msra.mxu2 %v259_v15  ;;  %310 = vmatpush.msra.mxu3 %v260_v16  ;;  %v367_v26 = vld [vmem:[%s700_s2] sm:$0xff] }
  0x31   : > { %455 = vmatpush.xpose.msra.mxu1 %v262_v14  ;;  %393 = vmatpush.msra.mxu0 %v319_v25  ;;  %v323_v33 = vld [vmem:[%s703_s5] sm:$0xff] }
  0x32   : > { %291 = vmatpush.msra.mxu2 %v257_v17  ;;  %311 = vmatpush.msra.mxu3 %v258_v18  ;;  %v422_v39 = vld [vmem:[%s702_s4] sm:$0xff] }
  0x33   : > { %517 = vmatmul.msk.f32.vlgmr.msra.gmra.mxu0 %vm365_vm5, %v367_v26 }
  0x34   : > { %292 = vmatpush.msra.mxu2 %v255_v19  ;;  %312 = vmatpush.msra.mxu3 %v256_v20 }
  0x35   : > { %513 = vmatmul.msk.f32.vlgmr.msra.gmra.mxu2 %vm266_vm3, %v265_v21  ;;  %515 = vmatmul.msk.f32.vlgmr.msra.gmra.mxu3 %vm266_vm3, %v265_v21 }
  0x36   : > { %358 = vmatpush.xpose.msrb.mxu3 %v322_v22  ;;  %338 = vmatpush.xpose.msrb.mxu2 %v321_v23 }
  0x37   : > { %456 = vmatpush.xpose.msra.mxu1 %v260_v16  ;;  %434 = vmatpush.xpose.msrb.mxu0 %v263_v11 }
  0x3a   : > { %359 = vmatpush.xpose.msrb.mxu3 %v320_v24  ;;  %339 = vmatpush.xpose.msrb.mxu2 %v319_v25 }
  0x3b   : > { %457 = vmatpush.xpose.msra.mxu1 %v258_v18  ;;  %435 = vmatpush.xpose.msrb.mxu0 %v261_v13 }
  0x3e   : > { %518 = vmatpush.msk.msra.mxu3 %vm371_vm4, %v322_v22 }
  0x3f   : > { %458 = vmatpush.xpose.msra.mxu1 %v256_v20  ;;  %436 = vmatpush.xpose.msrb.mxu0 %v259_v15 }
  0x40   : > { %413 = vmatpush.msra.mxu3 %v320_v24 }
  0x43   : > { %437 = vmatpush.xpose.msrb.mxu0 %v257_v17 }
  0x47   : > { %438 = vmatpush.xpose.msrb.mxu0 %v255_v19 }
  0xb0   : > { %v395_v31 = vpop.f32.mrf.mxu0 }
  0xb8   : > { %v294_v27 = vpop.f32.mrf.mxu2  ;;  %v314_v28 = vpop.f32.mrf.mxu3 }
  0xb9   : > { %v317_v29 = vmax.f32 %v294_v27, 0.0  ;;  %v318_v30 = vmax.f32 %v314_v28, 0.0 }
  0xbb   : > { %340 = vmatmul.f32.vlgmr.msrb.gmra.mxu2 %v317_v29  ;;  %360 = vmatmul.f32.vlgmr.msrb.gmra.mxu3 %v318_v30  ;;  %vm418_vm6 = vcmp.gt.f32.partialorder %v317_v29, 0.0  ;;  %vm419_vm7 = vcmp.gt.f32.partialorder %v318_v30, 0.0 }
  0xbc   : > { %520 = vmatmul.msk.f32.vlgmr.msrb.gmra.mxu0 %vm418_vm6, %v395_v31 }
  0xc3   : > { %519 = vmatmul.msk.f32.vlgmr.msra.gmra.mxu3 %vm365_vm5, %v367_v26 }
 0x139   : > { %v440_v38 = vpop.f32.mrf.mxu0 }
 0x13e   : > { %v341_v32 = vpop.f32.mrf.mxu2  ;;  %v361_v34 = vpop.f32.mrf.mxu3 }
 0x13f   : > { %v362_v35 = vadd.f32 %v361_v34, %v341_v32 }
 0x141   : > { %v364_v36 = vadd.f32 %v362_v35, %v323_v33 }
 0x143   : > { %366 = vst.msk [vmem:[%s703_s5] sm:$0xff] %vm365_vm5, %v364_v36 }
 0x146   : > { %v415_v37 = vpop.f32.mrf.mxu3 }
 0x147   : > { %521 = vmatmul.msk.f32.vlgmr.msra.gmra.mxu1 %vm419_vm7, %v415_v37 }
 0x1c4   : > { %v460_v40 = vpop.f32.mrf.mxu1 }
 0x1c5   : > { %v461_v41 = vadd.f32 %v460_v40, %v440_v38 }
 0x1c7   : > { %v463_v42 = vadd.f32 %v461_v41, %v422_v39 }
 0x1c9   : > { %464 = vst.msk [vmem:[%s702_s4] sm:$0xff] %vm266_vm3, %v463_v42 }
 0x1ca PF: > { %p13_p9 = scmp.ge.s32.totalorder %s624_s22, 4   ;;  %s704_s18 = smov %s570_s19 }
 0x1cb   : > { %s705_s19 = smov %s633_s25  ;;  %s706_s20 = smov %s624_s22 }
 0x1cc   :  { %15 = sbr.rel (!%p13_p9) target bundleno = 2 (0x2), region = 102 }

</bundles_post_ra>
